<compile_context>
chip_gen: v5e
topology: v5e:2x2
jax: 0.10.0
libtpu: 0.0.40
codegen_flags: <defaults>
</compile_context>

<pallas_src>
import jax
import jax.numpy as jnp
from jax.experimental import pallas as pl
from jax.experimental.pallas import tpu as pltpu


def _logreg_kernel(x_ref, w_ref, b_ref, o_ref):
    # x_ref: VMEM f32[TR, 256]  -- 128 samples/row, features interleaved on lanes
    # w_ref: VMEM f32[256, 128] -- sparse "de-interleave + dot" matrix
    # b_ref: SMEM f32[1]
    # o_ref: VMEM f32[TR, 128]  -- sample-major, fully lane-dense
    z = jnp.dot(
        x_ref[...], w_ref[...],
        preferred_element_type=jnp.float32,
        precision=jax.lax.Precision.HIGHEST,   # full-f32 MXU passes
    )
    o_ref[...] = jax.nn.sigmoid(z + b_ref[0]).astype(o_ref.dtype)


def logistic_regression_forward(x, weight, bias, *, tile_rows=4096):
    """sigmoid(x @ weight + bias) with x:[N,F], weight:[F,1] (= W_torch.T), bias:[1]."""
    n, in_features = x.shape
    out_features = weight.shape[1]
    assert weight.shape[0] == in_features and out_features == 1

    lanes = 128
    k_dim = lanes * in_features            # 256 for the Linear(2, 1) module

    # ---- layout: reinterpret the row-major [N, F] buffer ---------------------
    # Flat memory order is sample-major/feature-minor, so the contiguous buffer
    # reshapes (bitcast, no HBM traffic) to [N/128, 128*F]: row r, columns
    # F*c .. F*c+F-1 hold the features of sample 128*r + c.
    if n % lanes == 0:
        n_pad = n
        x2 = x.reshape(n_pad // lanes, k_dim)
    else:
        # TODO(synk): tail-padding copies x once; pass a 128-aligned batch to
        # stay exactly at the 12 bytes/sample HBM roofline.
        n_pad = pl.cdiv(n, lanes) * lanes
        x2 = jnp.zeros((n_pad, in_features), x.dtype).at[:n].set(x)
        x2 = x2.reshape(n_pad // lanes, k_dim)
    rows = n_pad // lanes

    # ---- fold the Linear weight into a de-interleave + dot matrix ------------
    # w_mat[m, c] = weight[m % F, 0] if m // F == c else 0, so
    # (x2 @ w_mat)[r, c] = sum_f x[128r + c, f] * weight[f, 0].
    m_idx = jax.lax.broadcasted_iota(jnp.int32, (k_dim, lanes), 0)
    c_idx = jax.lax.broadcasted_iota(jnp.int32, (k_dim, lanes), 1)
    w_vals = jnp.take(weight[:, 0].astype(jnp.float32), m_idx % in_features)
    w_mat = jnp.where(m_idx // in_features == c_idx, w_vals, jnp.float32(0.0))
    b_arr = bias.reshape(1).astype(jnp.float32)

    # ---- tiling ---------------------------------------------------------------
    max_tr = max(8, (int(tile_rows) // 8) * 8)     # sublane multiple
    if rows <= max_tr:
        tr = rows                                  # single block == full dim
    else:
        # >= ~8 grid steps (both v7x TCs get work, deep pipeline) while keeping
        # each step's DMA well above the ~0.35us fixed per-step overhead.
        tr = min(max_tr, max(1024, (pl.cdiv(rows, 8) // 8) * 8))
    grid = (pl.cdiv(rows, tr),)

    block_bytes = (tr * k_dim + tr * lanes + k_dim * lanes) * 4
    vmem_limit = max(32 * 1024 * 1024, 2 * block_bytes + (4 << 20))

    cost = pl.CostEstimate(
        flops=2 * rows * k_dim * lanes,
        transcendentals=rows * lanes,
        bytes_accessed=(rows * k_dim + rows * lanes + k_dim * lanes) * 4,
    )

    out2 = pl.pallas_call(
        _logreg_kernel,
        out_shape=jax.ShapeDtypeStruct((rows, lanes), x.dtype),
        grid=grid,
        in_specs=[
            pl.BlockSpec((tr, k_dim), lambda i: (i, 0)),          # streamed input
            pl.BlockSpec((k_dim, lanes), lambda i: (0, 0)),       # resident weight
            pl.BlockSpec(memory_space=pltpu.MemorySpace.SMEM),    # bias scalar
        ],
        out_specs=pl.BlockSpec((tr, lanes), lambda i: (i, 0)),
        compiler_params=pltpu.CompilerParams(
            dimension_semantics=("parallel",),
            vmem_limit_bytes=vmem_limit,
        ),
        cost_estimate=cost,
    )(x2, w_mat, b_arr)

    out = out2.reshape(n_pad, out_features)        # metadata-only
    return out if n == n_pad else out[:n]


if __name__ == "__main__":
    key = jax.random.PRNGKey(0)
    k_x, k_w, k_b = jax.random.split(key, 3)

    in_features, out_features = 2, 1
    batch = 8

    # Deterministic init mirroring nn.Linear default: U(-1/sqrt(in), 1/sqrt(in)).
    bound = 1.0 / jnp.sqrt(jnp.float32(in_features))
    weight = jax.random.uniform(
        k_w, (in_features, out_features), jnp.float32, -bound, bound
    )
    bias = jax.random.uniform(k_b, (out_features,), jnp.float32, -bound, bound)
    x = jax.random.normal(k_x, (batch, in_features), jnp.float32)

    out = jax.block_until_ready(logistic_regression_forward(x, weight, bias))

    # Exact elementwise f32 reference (no matmul-precision ambiguity).
    ref = jax.nn.sigmoid(x[:, 0:1] * weight[0, 0] + x[:, 1:2] * weight[1, 0] + bias[0])
    assert out.shape == (batch, out_features)
    assert jnp.allclose(out, ref, atol=1e-5), "mismatch vs reference"

    print("KERNEL_OK")
</pallas_src>

<mosaic_0001>
module attributes {stable_mosaic.version = 11 : i64} {
  func.func @_logreg_kernel(%arg0: i32, %arg1: memref<1x256xf32, #tpu.memory_space<vmem>>, %arg2: memref<256x128xf32, #tpu.memory_space<vmem>>, %arg3: memref<1xf32, #tpu.memory_space<smem>>, %arg4: memref<1x128xf32, #tpu.memory_space<vmem>>) attributes {dimension_semantics = [#tpu.dimension_semantics<parallel>], iteration_bounds = array<i64: 1>, scalar_prefetch = 0 : i64, scratch_operands = 0 : i64, tpu.core_type = #tpu.core_type<tc>, window_params = [{transform_indices = @transform_0, window_bounds = array<i64: 1, 256>}, {pipeline_mode = #tpu.pipeline_mode<synchronous>, transform_indices = @transform_1, window_bounds = array<i64: 256, 128>}, {transform_indices = @transform_2, window_bounds = array<i64: 1>}, {transform_indices = @transform_3, window_bounds = array<i64: 1, 128>}]} {
    %c0 = arith.constant 0 : index
    %c0_0 = arith.constant 0 : index
    %0 = vector.load %arg1[%c0, %c0_0] : memref<1x256xf32, #tpu.memory_space<vmem>>, vector<1x256xf32>
    %c0_1 = arith.constant 0 : index
    %c0_2 = arith.constant 0 : index
    %1 = vector.load %arg2[%c0_1, %c0_2] : memref<256x128xf32, #tpu.memory_space<vmem>>, vector<256x128xf32>
    %cst = arith.constant dense<0.000000e+00> : vector<1x128xf32>
    %2 = tpu.matmul %0, %1, %cst {dimension_numbers = #tpu.dot_dimension_numbers<[1], [0], [0], [1], [0, 0, 1, 1], [], []>, precision = #tpu.contract_precision<fp32>} : vector<1x256xf32>, vector<256x128xf32>, vector<1x128xf32> -> vector<1x128xf32>
    %c0_3 = arith.constant 0 : index
    %3 = memref.load %arg3[%c0_3] : memref<1xf32, #tpu.memory_space<smem>>
    %4 = vector.broadcast %3 : f32 to vector<1x128xf32>
    %5 = arith.addf %2, %4 : vector<1x128xf32>
    %6 = arith.negf %5 : vector<1x128xf32>
    %7 = math.exp %6 : vector<1x128xf32>
    %cst_4 = arith.constant 1.000000e+00 : f32
    %8 = vector.broadcast %cst_4 : f32 to vector<1x128xf32>
    %9 = arith.addf %8, %7 : vector<1x128xf32>
    %10 = arith.divf %8, %9 : vector<1x128xf32>
    %c0_5 = arith.constant 0 : index
    %c0_6 = arith.constant 0 : index
    %11 = vector.load %arg4[%c0_5, %c0_6] : memref<1x128xf32, #tpu.memory_space<vmem>>, vector<1x128xf32>
    tpu.vector_store %arg4[%c0_5, %c0_6], %10 {strides = array<i32>} : memref<1x128xf32, #tpu.memory_space<vmem>>, vector<1x128xf32>,
    return
  }
  func.func @transform_0(%arg0: i32) -> (i32, i32) {
    %c0_i32 = arith.constant 0 : i32
    %c0_i32_0 = arith.constant 0 : i32
    return %arg0, %c0_i32 : i32, i32
  }
  func.func @transform_1(%arg0: i32) -> (i32, i32) {
    %c0_i32 = arith.constant 0 : i32
    %c0_i32_0 = arith.constant 0 : i32
    %c0_i32_1 = arith.constant 0 : i32
    return %c0_i32, %c0_i32_0 : i32, i32
  }
  func.func @transform_2(%arg0: i32) -> i32 {
    %c0_i32 = arith.constant 0 : i32
    %c0_i32_0 = arith.constant 0 : i32
    return %c0_i32 : i32
  }
  func.func @transform_3(%arg0: i32) -> (i32, i32) {
    %c0_i32 = arith.constant 0 : i32
    %c0_i32_0 = arith.constant 0 : i32
    return %arg0, %c0_i32 : i32, i32
  }
}

</mosaic_0001>

<bundles_post_ra>
// kernel: tpu_custom_call.1
= control target key start
LH: loop header
LB: loop body
LE: loop exit
PB: predicated region body
PF: predicated region fallthrough
CT: control target
= control target key end

     0   :  { %9 = vsyncpa [#allocation4], 0  ;;  %s1398_s0 = inlined_call_operand.vmem [shape: f32[1,256], index: 0, kind: input, shape index: {}]   ;;  %s1399_s1 = inlined_call_operand.hbm [shape: f32[256,128], index: 1, kind: input, shape index: {}]   ;;  %s1400_s2 = inlined_call_operand.<no memory space> [shape: f32[1], index: 2, kind: input, shape index: {}]   ;;  %s1401_s3 = inlined_call_operand.hbm [shape: f32[1,128], index: 3, kind: output, shape index: {}]  }
   0x1   :  { %10 = vsyncpa [#allocation5], 0  ;;  %s17_s14 = sshll.u32 %s1399_s1, 4  ;;  %s852_s15 = smov [#allocation3]   ;;  %s18_s14 = int_to_ptr.hbm [resolvable:$true] %s17_s14 }
   0x2   :  { %s19_s16 = sshll.u32 %s852_s15, 4  ;;  %s853_s17 = smov 128   ;;  %s20_s16 = int_to_ptr.vmem [resolvable:$true] %s19_s16 }
   0x3   :  { %s854_s18 = smov 8  }
   0x4   :  { %25 = dma.hbm_to_vmem [thread:$0]  %s18_s14, 4096, %s20_s16, [#allocation4], %s853_s17, %s853_s17, %s854_s18  }
   0x5   :  { %848 = dma.done.wait [#allocation4], 4096  }
   0x6   :  { %849 = vsyncadd [#allocation4], 4294963200  ;;  %v48_v0 = vld [vmem:[#allocation3 + $0x78] sm:$0xff]  ;;  %v47_v1 = vld [vmem:[#allocation3 + $0x70] sm:$0xff]  ;;  %s781_s24 = sshll.u32 %s1401_s3, 4  ;;  %s782_s24 = int_to_ptr.hbm [resolvable:$true] %s781_s24 }
   0x7   :  { %v46_v2 = vld [vmem:[#allocation3 + $0x68] sm:$0xff]  ;;  %v879_v3 = vand.u32 4294901760, %v48_v0  ;;  %v881_v4 = vand.u32 4294901760, %v47_v1  ;;  %v45_v6 = vld [vmem:[#allocation3 + $0x60] sm:$0xff]  ;;  %v44_v7 = vld [vmem:[#allocation3 + $0x58] sm:$0xff] }
   0x8   :  { %v883_v5 = vand.u32 4294901760, %v46_v2  ;;  %v43_v8 = vld [vmem:[#allocation3 + $0x50] sm:$0xff]  ;;  %v885_v9 = vand.u32 4294901760, %v45_v6  ;;  %v887_v10 = vand.u32 4294901760, %v44_v7  ;;  %v42_v12 = vld [vmem:[#allocation3 + $0x48] sm:$0xff]  ;;  %v41_v13 = vld [vmem:[#allocation3 + $0x40] sm:$0xff] }
   0x9   :  { %v889_v11 = vand.u32 4294901760, %v43_v8  ;;  %73 = vmatpush.msra.mxu0 %v879_v3  ;;  %v893_v14 = vsub.f32 %v48_v0, %v879_v3  ;;  %v896_v15 = vsub.f32 %v47_v1, %v881_v4  ;;  %269 = vmatpush.msra.mxu3 %v879_v3  ;;  %v902_v17 = vand.u32 4294901760, %v42_v12  ;;  %v40_v21 = vld [vmem:[#allocation3 + $0x38] sm:$0xff]  ;;  %v39_v26 = vld [vmem:[#allocation3 + $0x30] sm:$0xff]  ;;  %v38_v36 = vld [vmem:[#allocation3 + $0x28] sm:$0xff] }
   0xa   :  { %v900_v16 = vsub.f32 %v46_v2, %v883_v5  ;;  %v905_v18 = vsub.f32 %v45_v6, %v885_v9  ;;  %v908_v19 = vsub.f32 %v44_v7, %v887_v10  ;;  %v910_v20 = vand.u32 4294901760, %v41_v13  ;;  %v37_v42 = vld [vmem:[#allocation3 + $0x20] sm:$0xff]  ;;  %v36_v47 = vld [vmem:[#allocation3 + $0x18] sm:$0xff]  ;;  %v35_v54 = vld [vmem:[#allocation3 + $0x10] sm:$0xff] }
   0xb   :  { %75 = vmatpush.msra.mxu0 %v881_v4  ;;  %216 = vmatpush.msra.mxu2 %v893_v14  ;;  %v115_v22 = vand.u32 4294901760, %v893_v14  ;;  %v1417_v23 = vand.u32 4294901760, %v896_v15  ;;  %v918_v25 = vsub.f32 %v43_v8, %v889_v11  ;;  %v924_v29 = vsub.f32 %v42_v12, %v902_v17  ;;  %v64_v59 = vld [vmem:[#allocation3 + $0xf8] sm:$0xff]  ;;  %v34_v61 = vld [vmem:[#allocation3 + $0x8] sm:$0xff]  ;;  %v63_v2 = vld [vmem:[#allocation3 + $0xf0] sm:$0xff] }
   0xc   :  { %v1415_v24 = vand.u32 4294901760, %v900_v16  ;;  %271 = vmatpush.msra.mxu3 %v881_v4  ;;  %v1413_v27 = vand.u32 4294901760, %v905_v18  ;;  %v1411_v28 = vand.u32 4294901760, %v908_v19  ;;  %v937_v33 = vand.u32 4294901760, %v40_v21  ;;  %v33_v7 = vld [vmem:[#allocation3] sm:$0xff] }
   0xd   :  { %77 = vmatpush.msra.mxu0 %v883_v5  ;;  %219 = vmatpush.msra.mxu2 %v896_v15  ;;  %v116_v30 = vsub.f32 %v893_v14, %v115_v22  ;;  %v122_v31 = vsub.f32 %v896_v15, %v1417_v23  ;;  %v940_v34 = vand.u32 4294901760, %v39_v26  ;;  %v943_v35 = vsub.f32 %v41_v13, %v910_v20  ;;  %v55_v23 = vld [vmem:[#allocation3 + $0xb0] sm:$0xff] }
   0xe   :  { %v128_v32 = vsub.f32 %v900_v16, %v1415_v24  ;;  %273 = vmatpush.msra.mxu3 %v883_v5  ;;  %v134_v39 = vsub.f32 %v905_v18, %v1413_v27  ;;  %v1409_v40 = vand.u32 4294901760, %v918_v25  ;;  %v140_v41 = vsub.f32 %v908_v19, %v1411_v28 }
   0xf   :  { %79 = vmatpush.msra.mxu0 %v885_v9  ;;  %v117_v37 = vand.u32 4294901760, %v116_v30  ;;  %222 = vmatpush.msra.mxu2 %v900_v16  ;;  %v123_v38 = vand.u32 4294901760, %v122_v31  ;;  %v956_v44 = vand.u32 4294901760, %v38_v36  ;;  %v1408_v45 = vand.u32 4294901760, %v924_v29 }
  0x10   :  { %275 = vmatpush.msra.mxu3 %v885_v9  ;;  %v129_v43 = vand.u32 4294901760, %v128_v32  ;;  %v960_v46 = vsub.f32 %v40_v21, %v937_v33  ;;  %v1407_v48 = vand.u32 4294901760, %v943_v35  ;;  %v135_v49 = vand.u32 4294901760, %v134_v39  ;;  %v62_v32 = vld [vmem:[#allocation3 + $0xe8] sm:$0xff] }
  0x11   :  { %81 = vmatpush.msra.mxu0 %v887_v10  ;;  %118 = vmatpush.msra.mxu1 %v117_v37  ;;  %v146_v50 = vsub.f32 %v918_v25, %v1409_v40  ;;  %v969_v51 = vand.u32 4294901760, %v37_v42  ;;  %v972_v52 = vsub.f32 %v39_v26, %v940_v34  ;;  %v976_v53 = vand.u32 4294901760, %v36_v47 }
  0x12   :  { %225 = vmatpush.msra.mxu2 %v905_v18  ;;  %277 = vmatpush.msra.mxu3 %v887_v10  ;;  %v141_v55 = vand.u32 4294901760, %v140_v41  ;;  %v152_v56 = vsub.f32 %v924_v29, %v1408_v45  ;;  %v1406_v57 = vand.u32 4294901760, %v960_v46  ;;  %v984_v58 = vsub.f32 %v38_v36, %v956_v44  ;;  %v61_v41 = vld [vmem:[#allocation3 + $0xe0] sm:$0xff] }
  0x13   :  { %83 = vmatpush.msra.mxu0 %v889_v11  ;;  %124 = vmatpush.msra.mxu1 %v123_v38  ;;  %v158_v60 = vsub.f32 %v943_v35, %v1407_v48  ;;  %v147_v62 = vand.u32 4294901760, %v146_v50  ;;  %v992_v63 = vand.u32 4294901760, %v35_v54  ;;  %v1405_v0 = vand.u32 4294901760, %v972_v52  ;;  %v57_v45 = vld [vmem:[#allocation3 + $0xc0] sm:$0xff] }
  0x14   :  { %228 = vmatpush.msra.mxu2 %v908_v19  ;;  %279 = vmatpush.msra.mxu3 %v889_v11  ;;  %v996_v1 = vsub.f32 %v37_v42, %v969_v51  ;;  %v1001_v6 = vsub.f32 %v36_v47, %v976_v53  ;;  %v1003_v8 = vand.u32 4294901760, %v64_v59  ;;  %v153_v12 = vand.u32 4294901760, %v152_v56 }
  0x15   :  { %85 = vmatpush.msra.mxu0 %v902_v17  ;;  %130 = vmatpush.msra.mxu1 %v129_v43  ;;  %v164_v13 = vsub.f32 %v960_v46, %v1406_v57  ;;  %v1009_v21 = vand.u32 4294901760, %v34_v61  ;;  %v1403_v26 = vand.u32 4294901760, %v984_v58  ;;  %v159_v30 = vand.u32 4294901760, %v158_v60  ;;  %v58_v57 = vld [vmem:[#allocation3 + $0xc8] sm:$0xff] }
  0x16   :  { %231 = vmatpush.msra.mxu2 %v918_v25  ;;  %281 = vmatpush.msra.mxu3 %v902_v17  ;;  %1422 = vst [vmem:[#allocation9_spill] sm:$0xff] %v1003_v8  ;;  %v1014_v31 = vand.u32 4294901760, %v63_v2  ;;  %v170_v36 = vsub.f32 %v972_v52, %v1405_v0  ;;  %v1020_v37 = vand.u32 4294901760, %v33_v7  ;;  %v1402_v38 = vand.u32 4294901760, %v996_v1 }
  0x17   :  { %87 = vmatpush.msra.mxu0 %v910_v20  ;;  %136 = vmatpush.msra.mxu1 %v135_v49  ;;  %v1024_v39 = vsub.f32 %v35_v54, %v992_v63  ;;  %v1404_v42 = vand.u32 4294901760, %v1001_v6  ;;  %v1030_v43 = vsub.f32 %v64_v59, %v1003_v8  ;;  %v165_v47 = vand.u32 4294901760, %v164_v13  ;;  %v60_v59 = vld [vmem:[#allocation3 + $0xd8] sm:$0xff] }
  0x18   :  { %234 = vmatpush.msra.mxu2 %v924_v29  ;;  %283 = vmatpush.msra.mxu3 %v910_v20  ;;  %1423 = vst [vmem:[#allocation10_spill] sm:$0xff] %v1020_v37  ;;  %v176_v49 = vsub.f32 %v984_v58, %v1403_v26  ;;  %v1037_v50 = vsub.f32 %v34_v61, %v1009_v21  ;;  %v1039_v54 = vand.u32 4294901760, %v62_v32  ;;  %v1046_v56 = vand.u32 4294901760, %v61_v41 }
  0x19   :  { %89 = vmatpush.msra.mxu0 %v937_v33  ;;  %142 = vmatpush.msra.mxu1 %v141_v55  ;;  %v1044_v55 = vsub.f32 %v63_v2, %v1014_v31  ;;  %v171_v60 = vand.u32 4294901760, %v170_v36  ;;  %v182_v61 = vsub.f32 %v996_v1, %v1402_v38  ;;  %v188_v2 = vsub.f32 %v1001_v6, %v1404_v42 }
  0x1a   :  { %237 = vmatpush.msra.mxu2 %v943_v35  ;;  %285 = vmatpush.msra.mxu3 %v937_v33  ;;  %v1412_v13 = vand.u32 4294901760, %v1030_v43  ;;  %v177_v36 = vand.u32 4294901760, %v176_v49  ;;  %v1414_v38 = vand.u32 4294901760, %v1037_v50  ;;  %v1067_v26 = vand.u32 4294901760, %v60_v59 }
  0x1b   :  { %91 = vmatpush.msra.mxu0 %v940_v34  ;;  %148 = vmatpush.msra.mxu1 %v147_v62  ;;  %v1410_v62 = vand.u32 4294901760, %v1024_v39  ;;  %v1416_v42 = vand.u32 4294901760, %v1044_v55  ;;  %v1073_v0 = vsub.f32 %v61_v41, %v1046_v56  ;;  %v189_v40 = vand.u32 4294901760, %v188_v2  ;;  %v56_v2 = vld [vmem:[#allocation3 + $0xb8] sm:$0xff] }
  0x1c   :  { %240 = vmatpush.msra.mxu2 %v960_v46  ;;  %287 = vmatpush.msra.mxu3 %v940_v34  ;;  %v457_v41 = vsub.f32 %v1030_v43, %v1412_v13  ;;  %v1095_v28 = vand.u32 4294901760, %v58_v57  ;;  %v1103_v27 = vand.u32 4294901760, %v57_v45  ;;  %v1115_v13 = vand.u32 4294901760, %v56_v2 }
  0x1d   :  { %93 = vmatpush.msra.mxu0 %v956_v44  ;;  %154 = vmatpush.msra.mxu1 %v153_v12  ;;  %v1054_v12 = vsub.f32 %v33_v7, %v1020_v37  ;;  %v1065_v7 = vsub.f32 %v62_v32, %v1039_v54  ;;  %v194_v32 = vsub.f32 %v1024_v39, %v1410_v62  ;;  %v1425_v14 = vand.u32 4294901760, %v896_v15 }
  0x1e   :  { %243 = vmatpush.msra.mxu2 %v972_v52  ;;  %289 = vmatpush.msra.mxu3 %v956_v44  ;;  %v1093_v62 = vsub.f32 %v60_v59, %v1067_v26  ;;  %v1427_v15 = vand.u32 4294901760, %v900_v16 }
  0x1f   :  { %95 = vmatpush.msra.mxu0 %v969_v51  ;;  %160 = vmatpush.msra.mxu1 %v159_v30  ;;  %v59_v30 = vld [vmem:[#allocation3 + $0xd0] sm:$0xff]  ;;  %v1418_v49 = vand.u32 4294901760, %v1054_v12  ;;  %v195_v59 = vand.u32 4294901760, %v194_v32 }
  0x20   :  { %246 = vmatpush.msra.mxu2 %v984_v58  ;;  %291 = vmatpush.msra.mxu3 %v969_v51  ;;  %v1080_v48 = vand.u32 4294901760, %v59_v30 }
  0x21   :  { %97 = vmatpush.msra.mxu0 %v976_v53  ;;  %166 = vmatpush.msra.mxu1 %v165_v47  ;;  %v183_v47 = vand.u32 4294901760, %v182_v61 }
  0x22   :  { %249 = vmatpush.msra.mxu2 %v996_v1  ;;  %293 = vmatpush.msra.mxu3 %v976_v53  ;;  %v1110_v24 = vsub.f32 %v59_v30, %v1080_v48  ;;  %v1136_v30 = vand.u32 4294901760, %v55_v23 }
  0x23   :  { %99 = vmatpush.msra.mxu0 %v992_v63  ;;  %172 = vmatpush.msra.mxu1 %v171_v60  ;;  %v200_v60 = vsub.f32 %v1037_v50, %v1414_v38  ;;  %v206_v38 = vsub.f32 %v1054_v12, %v1418_v49  ;;  %v1123_v49 = vsub.f32 %v58_v57, %v1095_v28 }
  0x24   :  { %252 = vmatpush.msra.mxu2 %v1001_v6  ;;  %295 = vmatpush.msra.mxu3 %v992_v63 }
  0x25   :  { %101 = vmatpush.msra.mxu0 %v1009_v21  ;;  %178 = vmatpush.msra.mxu1 %v177_v36  ;;  %v463_v36 = vsub.f32 %v1044_v55, %v1416_v42  ;;  %v458_v42 = vand.u32 4294901760, %v457_v41  ;;  %v201_v61 = vand.u32 4294901760, %v200_v60  ;;  %v1132_v60 = vsub.f32 %v57_v45, %v1103_v27  ;;  %v1146_v45 = vld [vmem:[%s1398_s0] sm:$0x3] }
  0x26   :  { %255 = vmatpush.msra.mxu2 %v1024_v39  ;;  %297 = vmatpush.msra.mxu3 %v1009_v21 }
  0x27   :  { %103 = vmatpush.msra.mxu0 %v1020_v37  ;;  %184 = vmatpush.msra.mxu1 %v183_v47  ;;  %v1424_v47 = vand.u32 4294901760, %v1065_v7 }
  0x28   :  { %258 = vmatpush.msra.mxu2 %v1037_v50  ;;  %299 = vmatpush.msra.mxu3 %v1020_v37  ;;  %v54_v37 = vld [vmem:[#allocation3 + $0xa8] sm:$0xff] }
  0x29   :  { %310 = vmatpush.msrb.mxu0 %v115_v22  ;;  %190 = vmatpush.msra.mxu1 %v189_v40  ;;  %v469_v32 = vsub.f32 %v1065_v7, %v1424_v47  ;;  %v464_v22 = vand.u32 4294901760, %v463_v36  ;;  %v1426_v40 = vand.u32 4294901760, %v1073_v0  ;;  %v207_v47 = vand.u32 4294901760, %v206_v38 }
  0x2a   :  { %261 = vmatpush.msra.mxu2 %v1054_v12  ;;  %459 = vmatpush.msrb.mxu3 %v458_v42  ;;  %v1141_v36 = vsub.f32 %v56_v2, %v1115_v13  ;;  %v1153_v42 = vand.u32 4294901760, %v54_v37  ;;  %v1429_v2 = vand.u32 4294901760, %v905_v18  ;;  %v68_v18 = vperm.slane %v1146_v45, 0 }
  0x2b   :  { %314 = vmatpush.msrb.mxu0 %v1425_v14  ;;  %v475_v41 = vsub.f32 %v1073_v0, %v1426_v40  ;;  %196 = vmatpush.msra.mxu1 %v195_v59  ;;  %v53_v14 = vld [vmem:[#allocation3 + $0xa0] sm:$0xff]  ;;  %v470_v38 = vand.u32 4294901760, %v469_v32  ;;  %v1428_v59 = vand.u32 4294901760, %v1093_v62 }
  0x2c   :  { %414 = vmatpush.msrb.mxu2 %v1003_v8  ;;  %465 = vmatpush.msrb.mxu3 %v464_v22  ;;  %v52_v8 = vld [vmem:[#allocation3 + $0x98] sm:$0xff]  ;;  %v1165_v16 = vand.u32 4294901760, %v53_v14  ;;  %v1431_v22 = vand.u32 4294901760, %v908_v19  ;;  %v1433_v19 = vand.u32 4294901760, %v918_v25  ;;  %v1435_v25 = vand.u32 4294901760, %v924_v29 }
  0x2d   :  { %318 = vmatpush.msrb.mxu0 %v1427_v15  ;;  %202 = vmatpush.msra.mxu1 %v201_v61  ;;  %v481_v40 = vsub.f32 %v1093_v62, %v1428_v59  ;;  %v476_v15 = vand.u32 4294901760, %v475_v41  ;;  %v1430_v61 = vand.u32 4294901760, %v1110_v24  ;;  %v1163_v59 = vsub.f32 %v55_v23, %v1136_v30 }
  0x2e   :  { %416 = vmatpush.msrb.mxu2 %v1014_v31  ;;  %471 = vmatpush.msrb.mxu3 %v470_v38  ;;  %v1179_v57 = vand.u32 4294901760, %v52_v8  ;;  %v51_v38 = vld [vmem:[#allocation3 + $0x90] sm:$0xff]  ;;  %v1192_v41 = vand.u32 4294901760, %v68_v18  ;;  %v1437_v29 = vand.u32 4294901760, %v943_v35  ;;  %v1439_v35 = vand.u32 4294901760, %v960_v46 }
  0x2f   :  { %322 = vmatpush.msrb.mxu0 %v1429_v2  ;;  %208 = vmatpush.msra.mxu1 %v207_v47  ;;  %v487_v32 = vsub.f32 %v1110_v24, %v1430_v61  ;;  %v482_v47 = vand.u32 4294901760, %v481_v40  ;;  %v1432_v2 = vand.u32 4294901760, %v1123_v49  ;;  %v1177_v61 = vsub.f32 %v54_v37, %v1153_v42 }
  0x30   :  { %418 = vmatpush.msrb.mxu2 %v1039_v54  ;;  %477 = vmatpush.msrb.mxu3 %v476_v15  ;;  %v1190_v37 = vsub.f32 %v53_v14, %v1165_v16  ;;  %v1202_v14 = vand.u32 4294901760, %v51_v38  ;;  %v1441_v46 = vand.u32 4294901760, %v972_v52 }
  0x31   :  { %326 = vmatpush.msrb.mxu0 %v1431_v22  ;;  %377 = vmatpush.msrb.mxu1 %v879_v3  ;;  %v493_v23 = vsub.f32 %v1123_v49, %v1432_v2  ;;  %v1434_v3 = vand.u32 4294901760, %v1132_v60  ;;  %v488_v40 = vand.u32 4294901760, %v487_v32  ;;  %v1205_v2 = vsub.f32 %v52_v8, %v1179_v57 }
  0x32   :  { %420 = vmatpush.msrb.mxu2 %v1046_v56  ;;  %483 = vmatpush.msrb.mxu3 %v482_v47  ;;  %v1438_v47 = vand.u32 4294901760, %v1163_v59  ;;  %v1216_v32 = vsub.f32 %v68_v18, %v1192_v41  ;;  %v1229_v18 = vsub.f32 %v51_v38, %v1202_v14 }
  0x33   :  { %330 = vmatpush.msrb.mxu0 %v1433_v19  ;;  %379 = vmatpush.msrb.mxu1 %v881_v4  ;;  %v499_v22 = vsub.f32 %v1132_v60, %v1434_v3  ;;  %v1436_v4 = vand.u32 4294901760, %v1141_v36  ;;  %v50_v3 = vld [vmem:[#allocation3 + $0x88] sm:$0xff]  ;;  %v494_v15 = vand.u32 4294901760, %v493_v23 }
  0x34   :  { %422 = vmatpush.msrb.mxu2 %v1067_v26  ;;  %489 = vmatpush.msrb.mxu3 %v488_v40  ;;  %v511_v23 = vsub.f32 %v1163_v59, %v1438_v47  ;;  %v1218_v8 = vand.u32 4294901760, %v50_v3 }
  0x35   :  { %334 = vmatpush.msrb.mxu0 %v1435_v25  ;;  %381 = vmatpush.msrb.mxu1 %v883_v5  ;;  %v505_v19 = vsub.f32 %v1141_v36, %v1436_v4  ;;  %v500_v5 = vand.u32 4294901760, %v499_v22  ;;  %v49_v25 = vld [vmem:[#allocation3 + $0x80] sm:$0xff]  ;;  %v522_v4 = vand.u32 4294901760, %v1190_v37  ;;  %v1440_v22 = vand.u32 4294901760, %v1177_v61 }
  0x36   :  { %424 = vmatpush.msrb.mxu2 %v1080_v48  ;;  %495 = vmatpush.msrb.mxu3 %v494_v15  ;;  %v1231_v47 = vand.u32 4294901760, %v49_v25  ;;  %v106_v15 = vand.u32 4294901760, %v1216_v32  ;;  %v1242_v38 = vsub.f32 %v50_v3, %v1218_v8 }
  0x37   :  { %338 = vmatpush.msrb.mxu0 %v1437_v29  ;;  %383 = vmatpush.msrb.mxu1 %v885_v9  ;;  %v506_v9 = vand.u32 4294901760, %v505_v19  ;;  %v517_v40 = vsub.f32 %v1177_v61, %v1440_v22  ;;  %v528_v29 = vand.u32 4294901760, %v1205_v2  ;;  %v523_v19 = vsub.f32 %v1190_v37, %v522_v4 }
  0x38   :  { %426 = vmatpush.msrb.mxu2 %v1095_v28  ;;  %501 = vmatpush.msrb.mxu3 %v500_v5  ;;  %v1254_v3 = vsub.f32 %v49_v25, %v1231_v47  ;;  %v1444_v22 = vand.u32 4294901760, %v1001_v6 }
  0x39   :  { %342 = vmatpush.msrb.mxu0 %v1439_v35  ;;  %385 = vmatpush.msrb.mxu1 %v887_v10  ;;  %v512_v10 = vand.u32 4294901760, %v511_v23  ;;  %v1442_v35 = vand.u32 4294901760, %v984_v58  ;;  %v518_v52 = vand.u32 4294901760, %v517_v40  ;;  %v529_v5 = vsub.f32 %v1205_v2, %v528_v29 }
  0x3a   :  { %428 = vmatpush.msrb.mxu2 %v1103_v27  ;;  %507 = vmatpush.msrb.mxu3 %v506_v9  ;;  %v534_v23 = vand.u32 4294901760, %v1229_v18  ;;  %v1443_v58 = vand.u32 4294901760, %v996_v1  ;;  %v540_v9 = vand.u32 4294901760, %v1242_v38  ;;  %v546_v40 = vand.u32 4294901760, %v1254_v3 }
  0x3b   :  { %346 = vmatpush.msrb.mxu0 %v1441_v46  ;;  %387 = vmatpush.msrb.mxu1 %v889_v11  ;;  %v69_v11 = vperm.slane %v1146_v45, 1  ;;  %v107_v45 = vsub.f32 %v1216_v32, %v106_v15  ;;  %v530_v1 = vand.u32 4294901760, %v529_v5  ;;  %v1445_v46 = vand.u32 4294901760, %v1024_v39 }
  0x3c   :  { %430 = vmatpush.msrb.mxu2 %v1115_v13  ;;  %513 = vmatpush.msrb.mxu3 %v512_v10  ;;  %v541_v6 = vsub.f32 %v1242_v38, %v540_v9  ;;  %v1446_v10 = vand.u32 4294901760, %v1037_v50 }
  0x3d   :  { %350 = vmatpush.msrb.mxu0 %v1442_v35  ;;  %389 = vmatpush.msrb.mxu1 %v902_v17  ;;  %v524_v17 = vand.u32 4294901760, %v523_v19  ;;  %v1266_v25 = vand.u32 4294901760, %v69_v11  ;;  %v1447_v35 = vand.u32 4294901760, %v1054_v12  ;;  %v1450_v12 = vld [vmem:[#allocation9_spill] sm:$0xff] }
  0x3e   :  { %432 = vmatpush.msrb.mxu2 %v1136_v30  ;;  %519 = vmatpush.msrb.mxu3 %v518_v52 }
  0x3f   :  { %354 = vmatpush.msrb.mxu0 %v1443_v58  ;;  %391 = vmatpush.msrb.mxu1 %v910_v20  ;;  %v535_v20 = vsub.f32 %v1229_v18, %v534_v23  ;;  %v1287_v19 = vsub.f32 %v69_v11, %v1266_v25 }
  0x40   :  { %434 = vmatpush.msrb.mxu2 %v1153_v42  ;;  %525 = vmatpush.msrb.mxu3 %v524_v17 }
  0x41   :  { %358 = vmatpush.msrb.mxu0 %v1444_v22  ;;  %393 = vmatpush.msrb.mxu1 %v937_v33  ;;  %v108_v33 = vand.u32 4294901760, %v107_v45  ;;  %v536_v39 = vand.u32 4294901760, %v535_v20  ;;  %v447_v11 = vand.u32 4294901760, %v1287_v19 }
  0x42   :  { %436 = vmatpush.msrb.mxu2 %v1165_v16  ;;  %531 = vmatpush.msrb.mxu3 %v530_v1 }
  0x43   :  { %362 = vmatpush.msrb.mxu0 %v1445_v46  ;;  %395 = vmatpush.msrb.mxu1 %v940_v34  ;;  %v547_v34 = vsub.f32 %v1254_v3, %v546_v40 }
  0x44   :  { %438 = vmatpush.msrb.mxu2 %v1179_v57  ;;  %109 = vmatmul.f32.vlgmr.msra.gmra.mxu0 %v108_v33 }
  0x45   :  { %366 = vmatpush.msrb.mxu0 %v1446_v10  ;;  %397 = vmatpush.msrb.mxu1 %v956_v44  ;;  %v542_v44 = vand.u32 4294901760, %v541_v6  ;;  %v548_v50 = vand.u32 4294901760, %v547_v34 }
  0x46   :  { %440 = vmatpush.msrb.mxu2 %v1202_v14  ;;  %537 = vmatpush.msrb.mxu3 %v536_v39 }
  0x47   :  { %370 = vmatpush.msrb.mxu0 %v1447_v35  ;;  %399 = vmatpush.msrb.mxu1 %v969_v51  ;;  %v1448_v51 = vand.u32 4294901760, %v1030_v43 }
  0x48   :  { %442 = vmatpush.msrb.mxu2 %v1218_v8  ;;  %543 = vmatpush.msrb.mxu3 %v542_v44 }
  0x49   :  { %557 = vmatpush.msra.mxu0 %v1030_v43  ;;  %401 = vmatpush.msrb.mxu1 %v976_v53  ;;  %v448_v53 = vsub.f32 %v1287_v19, %v447_v11 }
  0x4a   :  { %444 = vmatpush.msrb.mxu2 %v1231_v47  ;;  %549 = vmatpush.msrb.mxu3 %v548_v50 }
  0x4b   :  { %560 = vmatpush.msra.mxu0 %v1044_v55  ;;  %403 = vmatpush.msrb.mxu1 %v992_v63  ;;  %v1449_v63 = vand.u32 4294901760, %v1044_v55  ;;  %v449_v43 = vand.u32 4294901760, %v448_v53  ;;  %v1453_v55 = vand.u32 4294901760, %v1073_v0 }
  0x4c   :  { %264 = vmatmul.f32.vlgmr.msra.gmra.mxu2 %v1216_v32  ;;  %303 = vmatmul.f32.vlgmr.msra.gmra.mxu3 %v106_v15  ;;  %v1451_v32 = vld [vmem:[#allocation10_spill] sm:$0xff] }
  0x4d   :  { %563 = vmatpush.msra.mxu0 %v1065_v7  ;;  %651 = vmatpush.msra.mxu2 %v1448_v51 }
  0x4e   :  { %405 = vmatpush.msrb.mxu1 %v1009_v21  ;;  %718 = vmatpush.msra.mxu3 %v1450_v12  ;;  %v1452_v21 = vand.u32 4294901760, %v1065_v7  ;;  %v1454_v7 = vand.u32 4294901760, %v1093_v62 }
  0x4f   :  { %566 = vmatpush.msra.mxu0 %v1073_v0  ;;  %655 = vmatpush.msra.mxu2 %v1449_v63  ;;  %v1455_v0 = vand.u32 4294901760, %v1110_v24 }
  0x50   :  { %407 = vmatpush.msrb.mxu1 %v1451_v32  ;;  %720 = vmatpush.msra.mxu3 %v1014_v31 }
  0x51   :  { %569 = vmatpush.msra.mxu0 %v1093_v62  ;;  %210 = vmatmul.f32.vlgmr.msra.gmra.mxu1 %v1192_v41 }
  0x52   :  { %659 = vmatpush.msra.mxu2 %v1452_v21  ;;  %610 = vmatpush.msra.mxu1 %v1450_v12 }
  0x53   :  { %572 = vmatpush.msra.mxu0 %v1110_v24  ;;  %722 = vmatpush.msra.mxu3 %v1039_v54  ;;  %v1457_v24 = vand.u32 4294901760, %v1132_v60 }
  0x54   :  { %663 = vmatpush.msra.mxu2 %v1453_v55  ;;  %612 = vmatpush.msra.mxu1 %v1014_v31  ;;  %v1456_v31 = vand.u32 4294901760, %v1123_v49 }
  0x55   :  { %450 = vmatmul.f32.vlgmr.msrb.gmra.mxu2 %v449_v43  ;;  %575 = vmatpush.msra.mxu0 %v1123_v49 }
  0x56   :  { %614 = vmatpush.msra.mxu1 %v1039_v54  ;;  %667 = vmatpush.msra.mxu2 %v1454_v7 }
  0x57   :  { %724 = vmatpush.msra.mxu3 %v1046_v56  ;;  %372 = vmatmul.f32.vlgmr.msrb.gmra.mxu0 %v1192_v41 }
  0x58   :  { %551 = vmatmul.f32.vlgmr.msrb.gmra.mxu3 %v1266_v25  ;;  %578 = vmatpush.msra.mxu0 %v1132_v60 }
  0x59   :  { %616 = vmatpush.msra.mxu1 %v1046_v56  ;;  %671 = vmatpush.msra.mxu2 %v1455_v0 }
  0x5a   :  { %726 = vmatpush.msra.mxu3 %v1067_v26  ;;  %409 = vmatmul.f32.vlgmr.msrb.gmra.mxu1 %v1192_v41 }
  0x5b   :  { %581 = vmatpush.msra.mxu0 %v1141_v36  ;;  %618 = vmatpush.msra.mxu1 %v1067_v26  ;;  %v1458_v26 = vand.u32 4294901760, %v1141_v36 }
  0x5c   :  { %675 = vmatpush.msra.mxu2 %v1456_v31  ;;  %728 = vmatpush.msra.mxu3 %v1080_v48 }
  0x5d   :  { %584 = vmatpush.msra.mxu0 %v1163_v59  ;;  %620 = vmatpush.msra.mxu1 %v1080_v48  ;;  %v1459_v48 = vand.u32 4294901760, %v1163_v59 }
  0x5e   :  { %679 = vmatpush.msra.mxu2 %v1457_v24  ;;  %730 = vmatpush.msra.mxu3 %v1095_v28 }
  0x5f   :  { %587 = vmatpush.msra.mxu0 %v1177_v61  ;;  %622 = vmatpush.msra.mxu1 %v1095_v28  ;;  %v1460_v28 = vand.u32 4294901760, %v1177_v61 }
  0x60   :  { %683 = vmatpush.msra.mxu2 %v1458_v26  ;;  %732 = vmatpush.msra.mxu3 %v1103_v27 }
  0x61   :  { %590 = vmatpush.msra.mxu0 %v1190_v37  ;;  %624 = vmatpush.msra.mxu1 %v1103_v27  ;;  %v66_v27 = vstv %s1400_s2  ;;  %s855_s2 = smov [#allocation6]  }
  0x62   :  { %687 = vmatpush.msra.mxu2 %v1459_v48  ;;  %734 = vmatpush.msra.mxu3 %v1115_v13  ;;  %s779_s21 = sshll.u32 %s855_s2, 4  ;;  %s780_s21 = int_to_ptr.vmem [resolvable:$true] %s779_s21 }
  0x63   :  { %593 = vmatpush.msra.mxu0 %v1205_v2  ;;  %626 = vmatpush.msra.mxu1 %v1115_v13 }
  0x64   :  { %691 = vmatpush.msra.mxu2 %v1460_v28  ;;  %736 = vmatpush.msra.mxu3 %v1136_v30 }
  0x65   :  { %596 = vmatpush.msra.mxu0 %v1229_v18  ;;  %628 = vmatpush.msra.mxu1 %v1136_v30 }
  0x66   :  { %695 = vmatpush.msra.mxu2 %v522_v4  ;;  %738 = vmatpush.msra.mxu3 %v1153_v42 }
  0x67   :  { %599 = vmatpush.msra.mxu0 %v1242_v38  ;;  %630 = vmatpush.msra.mxu1 %v1153_v42 }
  0x68   :  { %699 = vmatpush.msra.mxu2 %v528_v29  ;;  %740 = vmatpush.msra.mxu3 %v1165_v16 }
  0x69   :  { %602 = vmatpush.msra.mxu0 %v1254_v3  ;;  %632 = vmatpush.msra.mxu1 %v1165_v16 }
  0x6a   :  { %703 = vmatpush.msra.mxu2 %v534_v23  ;;  %742 = vmatpush.msra.mxu3 %v1179_v57 }
  0x6b   :  { %605 = vmatmul.f32.vlgmr.msra.gmra.mxu0 %v1287_v19  ;;  %634 = vmatpush.msra.mxu1 %v1179_v57 }
  0x6c   :  { %707 = vmatpush.msra.mxu2 %v540_v9  ;;  %744 = vmatpush.msra.mxu3 %v1202_v14 }
  0x6d   :  { %636 = vmatpush.msra.mxu1 %v1202_v14 }
  0x6e   :  { %711 = vmatpush.msra.mxu2 %v546_v40  ;;  %746 = vmatpush.msra.mxu3 %v1218_v8 }
  0x6f   :  { %713 = vmatmul.f32.vlgmr.msra.gmra.mxu2 %v1266_v25  ;;  %638 = vmatpush.msra.mxu1 %v1218_v8 }
  0x70   :  { %748 = vmatpush.msra.mxu3 %v1231_v47 }
  0x71   :  { %750 = vmatmul.f32.vlgmr.msra.gmra.mxu3 %v1266_v25  ;;  %640 = vmatpush.msra.mxu1 %v1231_v47 }
  0x72   :  { %644 = vmatmul.f32.vlgmr.msra.gmra.mxu1 %v447_v11 }
  0xc1   :  { %v110_v54 = vpop.f32.mrf.mxu0 }
  0xc2   :  { %v111_v56 = vadd.f32 %v110_v54, %v66_v27 }
  0xce   :  { %v211_v62 = vpop.f32.mrf.mxu1 }
  0xcf   :  { %v212_v13 = vadd.f32 %v211_v62, %v111_v56  ;;  %v265_v49 = vpop.f32.mrf.mxu2  ;;  %v304_v60 = vpop.f32.mrf.mxu3 }
  0xd1   :  { %v266_v30 = vadd.f32 %v265_v49, %v212_v13 }
  0xd3   :  { %v305_v57 = vadd.f32 %v304_v60, %v266_v30 }
  0xd4   :  { %v373_v36 = vpop.f32.mrf.mxu0 }
  0xd5   :  { %v374_v16 = vadd.f32 %v373_v36, %v305_v57 }
  0xd7   :  { %v410_v42 = vpop.f32.mrf.mxu1 }
  0xd8   :  { %v411_v59 = vadd.f32 %v410_v42, %v374_v16  ;;  %v451_v41 = vpop.f32.mrf.mxu2 }
  0xda   :  { %v452_v61 = vadd.f32 %v451_v41, %v411_v59 }
  0xdb   :  { %v552_v2 = vpop.f32.mrf.mxu3 }
  0xdc   :  { %v553_v14 = vadd.f32 %v552_v2, %v452_v61 }
  0xe8   :  { %v606_v37 = vpop.f32.mrf.mxu0 }
  0xe9   :  { %v607_v4 = vadd.f32 %v606_v37, %v553_v14 }
  0xef   :  { %v645_v8 = vpop.f32.mrf.mxu1 }
  0xf0   :  { %v646_v29 = vadd.f32 %v645_v8, %v607_v4 }
  0xf2   :  { %v714_v18 = vpop.f32.mrf.mxu2 }
  0xf3   :  { %v715_v47 = vadd.f32 %v714_v18, %v646_v29 }
  0xf4   :  { %v751_v15 = vpop.f32.mrf.mxu3 }
  0xf5   :  { %v752_v38 = vadd.f32 %v751_v15, %v715_v47 }
  0xf7   :  { %v791_v52 = vmul.f32 -1.442695, %v752_v38 }
  0xf9   :  { %796 = vpow2.f32 %v791_v52 }
  0xff   :  { %v797_v5 = vpop.eup %796 }
 0x100   :  { %v757_v23 = vadd.f32 1.0, %v797_v5 }
 0x102   :  { %798 = vrcp.f32 %v757_v23  ;;  %v769_v45 = vand.u32 2147483648, %v757_v23  ;;  %v767_v22 = vand.u32 2147483647, %v757_v23  ;;  %vm763_vm1 = vweird.f32 %v757_v23 }
 0x104   :  { %v770_v25 = vor.u32 1.1754944e-38, %v769_v45  ;;  %vm768_vm3 = vcmp.eq.f32.partialorder %v767_v22, 8.507059e+37 }
 0x108   :  { %v799_v3 = vpop.eup %798 }
 0x109   :  { %v759_v58 = vmul.f32 %v799_v3, %v757_v23  ;;  %vm764_vm0 = vweird.f32 %v799_v3 }
 0x10a   :  { %vm765_vm2 = vmor %vm763_vm1, %vm764_vm0 }
 0x10b   :  { %v760_v17 = vsub.f32 1.0, %v759_v58 }
 0x10d   :  { %v761_v9 = vmul.f32 %v799_v3, %v760_v17 }
 0x10f   :  { %v762_v1 = vadd.f32 %v799_v3, %v761_v9 }
 0x111   :  { %v766_v20 = vsel %vm765_vm2, %v799_v3, %v762_v1 }
 0x112   :  { %v771_v40 = vsel %vm768_vm3, %v770_v25, %v766_v20 }
 0x113   :  { %773 = vst [vmem:[#allocation6] sm:$0x1] %v771_v40 }
 0x114   :  { %784 = dma.vmem_to_hbm [thread:$0]  %s780_s21, 16, %s782_s24, [#allocation5]  }
 0x115   :  { %850 = dma.done.wait [#allocation5], 16  }
 0x116   :  { %851 = vsyncadd [#allocation5], 4294967280 }
 0x117   :  { %789 = vsyncpa [#allocation4], 1 }
 0x118   :  { %790 = vsyncpa [#allocation5], 1 }

</bundles_post_ra>
